<compile_context>
chip_gen: v7x
topology: tpu7x:2x2x1
jax: 0.10.0
libtpu: 0.0.40
codegen_flags: <defaults>
</compile_context>

<pallas_src>
import functools

import jax
import jax.numpy as jnp
from jax.experimental import pallas as pl
from jax.experimental.pallas import tpu as pltpu


# ----------------------------- in-kernel helpers -----------------------------

def _gelu(x):
    # tanh-approximation GELU: 0.5*x*(1 + tanh(sqrt(2/pi)*(x + 0.044715*x^3))).
    # tanh rides the EUP slot; everything else is cheap VALU work.
    c = 0.7978845608028654  # sqrt(2/pi)
    return 0.5 * x * (1.0 + jnp.tanh(c * (x + 0.044715 * (x * x * x))))


# --------------------------------- the kernel --------------------------------

def _caffn_kernel(x_ref, pf_ref, pc_ref, o_ref, *, H, W, C, Cop, F, compute_dtype):
    """One image: x_ref (C, HW), o_ref (Cop, HW)."""
    f32 = jnp.float32
    cd = compute_dtype
    L = H * W

    # ---- unpack the two parameter bundles (static slices, no copies) --------
    pf = pf_ref[...].astype(f32)                    # (F, C + 12)
    fc1_w = pf[:, 0:C]                              # (F, C)
    dw_w = pf[:, C:C + 9].astype(cd)                # (F, 9)  depthwise taps
    fc1_b = pf[:, C + 9:C + 10]                     # (F, 1)
    dw_b = pf[:, C + 10:C + 11].astype(cd)          # (F, 1)
    sigma = pf[:, C + 11:C + 12].astype(cd)         # (F, 1)  ElementScale

    pc = pc_ref[...].astype(f32)                    # (Cop + 1, F + 2)
    fc2_w = pc[0:Cop, 0:F].astype(cd)               # (Cop, F) (zero-padded rows)
    fc2_b = pc[0:Cop, F:F + 1]                      # (Cop, 1)
    dec_w_row = pc[Cop:Cop + 1, 0:F].astype(cd)     # (1, F)   decompose weight (row)
    dec_b = pc[Cop:Cop + 1, F + 1:F + 2]            # (1, 1)

    x = x_ref[...].astype(f32)                      # (C, L)

    # ---- fc1: 1x1 conv == one MXU matmul, contraction K = C -----------------
    h = (jnp.dot(fc1_w, x, preferred_element_type=f32) + fc1_b).astype(cd)   # (F, L)

    # ---- hoisted boundary masks (computed once) -----------------------------
    lane = jax.lax.broadcasted_iota(jnp.int32, (1, L), 1)
    if (W & (W - 1)) == 0:
        col = jnp.bitwise_and(lane, W - 1)
        row = jax.lax.shift_right_logical(lane, W.bit_length() - 1)
    else:
        col = lane % W
        row = lane // W
    cm_m1 = (col >= 1).astype(cd)          # column valid for dwc = -1
    cm_p1 = (col <= W - 2).astype(cd)      # column valid for dwc = +1
    rm_m1 = (row >= 1).astype(cd)          # row valid for dh = -1
    rm_p1 = (row <= H - 2).astype(cd)      # row valid for dh = +1

    # ---- depthwise 3x3: 4 XLU rolls, masks applied once per group -----------
    # g_m1[q] = h[q-1] (col-masked), g_p1[q] = h[q+1] (col-masked).  Row rolls
    # shift by multiples of W (mod L=HW), so the column mask stays valid at the
    # output position and rm_* kills wrap-around rows.
    g_m1 = pltpu.roll(h, 1, axis=1) * cm_m1
    g_p1 = pltpu.roll(h, L - 1, axis=1) * cm_p1

    def row_sum(t):  # t = dh + 1, weights flattened row-major: tap = 3*t + (dwc+1)
        return (dw_w[:, 3 * t + 0:3 * t + 1] * g_m1
                + dw_w[:, 3 * t + 1:3 * t + 2] * h
                + dw_w[:, 3 * t + 2:3 * t + 3] * g_p1)

    acc = row_sum(1)                                               # dh =  0
    acc = acc + pltpu.roll(row_sum(0), W, axis=1) * rm_m1          # dh = -1
    acc = acc + pltpu.roll(row_sum(2), L - W, axis=1) * rm_p1      # dh = +1

    h = _gelu(acc + dw_b)
    # nn.Dropout(p=0.0) is the identity -> omitted.

    # ---- feat_decompose: h + sigma * (h - GELU(decompose(h))) ---------------
    # channel reduction on the (otherwise idle) MXU instead of VALU+XLU.
    dec = jnp.dot(dec_w_row, h, preferred_element_type=f32) + dec_b    # (1, L) f32
    h = h + sigma * (h - _gelu(dec).astype(cd))

    # ---- fc2: 1x1 conv == one MXU matmul, single full-tile store ------------
    out = jnp.dot(fc2_w, h, preferred_element_type=f32) + fc2_b        # (Cop, L)
    o_ref[...] = out.astype(o_ref.dtype)


# --------------------------------- wrapper -----------------------------------

def _round_up8(v):
    return -(-v // 8) * 8


def channel_aggregation_ffn(x_nchw, params, *, compute_dtype=jnp.float32):
    """compute_dtype=jnp.bfloat16 is recommended on v6e/v7x (bf16-native VPU/EUP);
    keep float32 on v5e or when strict parity with the torch module is needed."""
    N, C, H, W = x_nchw.shape
    HW = H * W
    F = params["fc1_w"].shape[0]
    Cop = _round_up8(C)  # padded fc2 output rows -> unmasked full-tile store

    # --- host glue: pack the 9 tiny params into 2 bundles (2 DMAs) ------------
    pf = jnp.concatenate(
        [params["fc1_w"], params["dw_w"], params["fc1_b"],
         params["dw_b"], params["sigma"]], axis=1).astype(jnp.float32)   # (F, C+12)

    pc = jnp.zeros((Cop + 1, F + 2), jnp.float32)
    pc = pc.at[0:C, 0:F].set(params["fc2_w"].astype(jnp.float32))
    pc = pc.at[0:C, F].set(params["fc2_b"].astype(jnp.float32)[:, 0])
    pc = pc.at[Cop, 0:F].set(params["dec_w"].astype(jnp.float32)[:, 0])
    pc = pc.at[Cop, F + 1].set(params["dec_b"].reshape(()))               # (Cop+1, F+2)

    # --- free reshape only: no transpose, no activation padding ---------------
    xl = x_nchw.reshape(N, C, HW)

    kern = functools.partial(_caffn_kernel, H=H, W=W, C=C, Cop=Cop, F=F,
                             compute_dtype=compute_dtype)

    # Rough per-image VMEM footprint (in/out blocks double-buffered + live (F,L)
    # temporaries).  Only raise the scoped limit when the default would clip it.
    est_bytes = 4 * HW * (2 * (C + Cop) + 8 * F)
    cp_kwargs = dict(dimension_semantics=("parallel",))
    if est_bytes > 24 * 1024 * 1024:
        try:
            cap = int(pltpu.get_tpu_info().vmem_capacity_bytes)
        except Exception:
            cap = 64 * 1024 * 1024
        cp_kwargs["vmem_limit_bytes"] = min(est_bytes + (8 << 20), cap)
        # TODO(synk): chunk the HW lane axis inside the kernel when F*HW outgrows
        # v7x's 64 MiB per-TC VMEM (large feedforward_channels / spatial sizes).

    out = pl.pallas_call(
        kern,
        out_shape=jax.ShapeDtypeStruct((N, Cop, HW), jnp.float32),
        grid=(N,),
        in_specs=[
            pl.BlockSpec((None, C, HW), lambda b: (b, 0, 0)),   # one image / step
            pl.BlockSpec(pf.shape, lambda b: (0, 0)),           # param bundle (const)
            pl.BlockSpec(pc.shape, lambda b: (0, 0)),           # param bundle (const)
        ],
        out_specs=pl.BlockSpec((None, Cop, HW), lambda b: (b, 0, 0)),
        compiler_params=pltpu.CompilerParams(**cp_kwargs),
    )(xl, pf, pc)

    if Cop != C:
        out = out[:, :C, :]   # drop pad rows (tiny; no-op when C % 8 == 0)
    return out.reshape(N, C, H, W)


# ------------------------------ params / reference ----------------------------

def init_params(key, embed_dims=4, ffn_ratio=4):
    """Deterministic synthetic parameters matching ChannelAggregationFFN shapes.

    1x1 conv weights stored (Cout, Cin); depthwise 3x3 weight stored (F, 9);
    per-channel vectors stored (F, 1) / (C, 1)."""
    C = embed_dims
    F = int(C * ffn_ratio)
    ks = jax.random.split(key, 8)

    def nrm(k, shape, scale=0.1):
        return (scale * jax.random.normal(k, shape)).astype(jnp.float32)

    return dict(
        fc1_w=nrm(ks[0], (F, C)),
        fc1_b=nrm(ks[1], (F, 1)),
        dw_w=nrm(ks[2], (F, 9)),           # Conv2d(F,F,3,groups=F).weight (F,1,3,3)
        dw_b=nrm(ks[3], (F, 1)),
        dec_w=nrm(ks[4], (F, 1)),          # decompose Conv2d(F,1,1).weight (1,F,1,1)
        dec_b=nrm(ks[5], (1, 1)),
        sigma=jnp.full((F, 1), 1e-5, jnp.float32),  # ElementScale init_value
        fc2_w=nrm(ks[6], (C, F)),
        fc2_b=nrm(ks[7], (C, 1)),
    )


def _reference(x, params):
    """Pure-JAX reference of the PyTorch forward (for a correctness check)."""
    N, C, H, W = x.shape
    F = params["fc1_w"].shape[0]
    h = (jnp.einsum("fc,nchw->nfhw", params["fc1_w"], x)
         + params["fc1_b"].reshape(1, F, 1, 1))
    h = jax.lax.conv_general_dilated(
        h, params["dw_w"].reshape(F, 1, 3, 3), window_strides=(1, 1),
        padding=((1, 1), (1, 1)), dimension_numbers=("NCHW", "OIHW", "NCHW"),
        feature_group_count=F) + params["dw_b"].reshape(1, F, 1, 1)
    h = jax.nn.gelu(h, approximate=False)
    dec = (jnp.einsum("f,nfhw->nhw", params["dec_w"][:, 0], h)[:, None]
           + params["dec_b"].reshape(1, 1, 1, 1))
    h = h + params["sigma"].reshape(1, F, 1, 1) * (h - jax.nn.gelu(dec, approximate=False))
    return (jnp.einsum("cf,nfhw->nchw", params["fc2_w"], h)
            + params["fc2_b"].reshape(1, C, 1, 1))


if __name__ == "__main__":
    N, C, H, W = 2, 4, 16, 16
    key = jax.random.PRNGKey(0)
    kx, kp = jax.random.split(key)
    x = jax.random.normal(kx, (N, C, H, W), dtype=jnp.float32)
    params = init_params(kp, embed_dims=C, ffn_ratio=4)

    y = jax.jit(channel_aggregation_ffn)(x, params)
    y = jax.block_until_ready(y)
    assert y.shape == (N, C, H, W) and y.dtype == jnp.float32

    y_ref = _reference(x, params)
    err = float(jnp.max(jnp.abs(y - y_ref)))
    assert jnp.allclose(y, y_ref, atol=2e-3, rtol=2e-2), f"max abs err {err}"
    print("KERNEL_OK")
</pallas_src>

<mosaic_0001>
module attributes {stable_mosaic.version = 11 : i64} {
  func.func @_caffn_kernel(%arg0: i32, %arg1: memref<1x4x256xf32, #tpu.memory_space<vmem>>, %arg2: memref<16x16xf32, #tpu.memory_space<vmem>>, %arg3: memref<9x18xf32, #tpu.memory_space<vmem>>, %arg4: memref<1x8x256xf32, #tpu.memory_space<vmem>>) attributes {dimension_semantics = [#tpu.dimension_semantics<parallel>], iteration_bounds = array<i64: 2>, scalar_prefetch = 0 : i64, scratch_operands = 0 : i64, tpu.core_type = #tpu.core_type<tc>, window_params = [{transform_indices = @transform_0, window_bounds = array<i64: 1, 4, 256>}, {pipeline_mode = #tpu.pipeline_mode<synchronous>, transform_indices = @transform_1, window_bounds = array<i64: 16, 16>}, {pipeline_mode = #tpu.pipeline_mode<synchronous>, transform_indices = @transform_2, window_bounds = array<i64: 9, 18>}, {transform_indices = @transform_3, window_bounds = array<i64: 1, 8, 256>}]} {
    %c0 = arith.constant 0 : index
    %c0_0 = arith.constant 0 : index
    %0 = vector.load %arg2[%c0, %c0_0] : memref<16x16xf32, #tpu.memory_space<vmem>>, vector<16x16xf32>
    %1 = vector.extract_strided_slice %0 {offsets = [0, 0], sizes = [16, 4], strides = [1, 1]} : vector<16x16xf32> to vector<16x4xf32>
    %2 = vector.extract_strided_slice %0 {offsets = [0, 4], sizes = [16, 9], strides = [1, 1]} : vector<16x16xf32> to vector<16x9xf32>
    %3 = vector.extract_strided_slice %0 {offsets = [0, 13], sizes = [16, 1], strides = [1, 1]} : vector<16x16xf32> to vector<16x1xf32>
    %4 = vector.extract_strided_slice %0 {offsets = [0, 14], sizes = [16, 1], strides = [1, 1]} : vector<16x16xf32> to vector<16x1xf32>
    %5 = vector.extract_strided_slice %0 {offsets = [0, 15], sizes = [16, 1], strides = [1, 1]} : vector<16x16xf32> to vector<16x1xf32>
    %c0_1 = arith.constant 0 : index
    %c0_2 = arith.constant 0 : index
    %6 = vector.load %arg3[%c0_1, %c0_2] : memref<9x18xf32, #tpu.memory_space<vmem>>, vector<9x18xf32>
    %7 = vector.extract_strided_slice %6 {offsets = [0, 0], sizes = [8, 16], strides = [1, 1]} : vector<9x18xf32> to vector<8x16xf32>
    %8 = vector.extract_strided_slice %6 {offsets = [0, 16], sizes = [8, 1], strides = [1, 1]} : vector<9x18xf32> to vector<8x1xf32>
    %9 = vector.extract_strided_slice %6 {offsets = [8, 0], sizes = [1, 16], strides = [1, 1]} : vector<9x18xf32> to vector<1x16xf32>
    %10 = vector.extract_strided_slice %6 {offsets = [8, 17], sizes = [1, 1], strides = [1, 1]} : vector<9x18xf32> to vector<1x1xf32>
    %c0_3 = arith.constant 0 : index
    %c0_4 = arith.constant 0 : index
    %c0_5 = arith.constant 0 : index
    %11 = vector.load %arg1[%c0_3, %c0_4, %c0_5] : memref<1x4x256xf32, #tpu.memory_space<vmem>>, vector<1x4x256xf32>
    %12 = vector.shape_cast %11 : vector<1x4x256xf32> to vector<4x256xf32>
    %cst = arith.constant dense<0.000000e+00> : vector<16x256xf32>
    %13 = tpu.matmul %1, %12, %cst {dimension_numbers = #tpu.dot_dimension_numbers<[1], [0], [0], [1], [0, 0, 1, 1], [], []>} : vector<16x4xf32>, vector<4x256xf32>, vector<16x256xf32> -> vector<16x256xf32>
    %14 = vector.broadcast %3 : vector<16x1xf32> to vector<16x256xf32>
    %15 = arith.addf %13, %14 : vector<16x256xf32>
    %16 = tpu.iota {dimensions = array<i32: 1>} : vector<1x256xi32>
    %c15_i32 = arith.constant 15 : i32
    %17 = vector.broadcast %c15_i32 : i32 to vector<1x256xi32>
    %18 = arith.andi %16, %17 : vector<1x256xi32>
    %c4_i32 = arith.constant 4 : i32
    %19 = vector.broadcast %c4_i32 : i32 to vector<1x256xi32>
    %20 = arith.shrui %16, %19 : vector<1x256xi32>
    %c1_i32 = arith.constant 1 : i32
    %21 = vector.broadcast %c1_i32 : i32 to vector<1x256xi32>
    %22 = arith.cmpi sge, %18, %21 : vector<1x256xi32>
    %23 = arith.extui %22 : vector<1x256xi1> to vector<1x256xi32>
    %24 = arith.sitofp %23 : vector<1x256xi32> to vector<1x256xf32>
    %c14_i32 = arith.constant 14 : i32
    %25 = vector.broadcast %c14_i32 : i32 to vector<1x256xi32>
    %26 = arith.cmpi sle, %18, %25 : vector<1x256xi32>
    %27 = arith.extui %26 : vector<1x256xi1> to vector<1x256xi32>
    %28 = arith.sitofp %27 : vector<1x256xi32> to vector<1x256xf32>
    %c1_i32_6 = arith.constant 1 : i32
    %29 = vector.broadcast %c1_i32_6 : i32 to vector<1x256xi32>
    %30 = arith.cmpi sge, %20, %29 : vector<1x256xi32>
    %31 = arith.extui %30 : vector<1x256xi1> to vector<1x256xi32>
    %32 = arith.sitofp %31 : vector<1x256xi32> to vector<1x256xf32>
    %c14_i32_7 = arith.constant 14 : i32
    %33 = vector.broadcast %c14_i32_7 : i32 to vector<1x256xi32>
    %34 = arith.cmpi sle, %20, %33 : vector<1x256xi32>
    %35 = arith.extui %34 : vector<1x256xi1> to vector<1x256xi32>
    %36 = arith.sitofp %35 : vector<1x256xi32> to vector<1x256xf32>
    %c1_i32_8 = arith.constant 1 : i32
    %37 = tpu.dynamic_rotate %15 by %c1_i32_8 dim 1 : vector<16x256xf32>, i32 -> vector<16x256xf32>
    %38 = vector.broadcast %24 : vector<1x256xf32> to vector<16x256xf32>
    %39 = arith.mulf %37, %38 : vector<16x256xf32>
    %c255_i32 = arith.constant 255 : i32
    %40 = tpu.dynamic_rotate %15 by %c255_i32 dim 1 : vector<16x256xf32>, i32 -> vector<16x256xf32>
    %41 = vector.broadcast %28 : vector<1x256xf32> to vector<16x256xf32>
    %42 = arith.mulf %40, %41 : vector<16x256xf32>
    %43 = vector.extract_strided_slice %2 {offsets = [0, 3], sizes = [16, 1], strides = [1, 1]} : vector<16x9xf32> to vector<16x1xf32>
    %44 = vector.broadcast %43 : vector<16x1xf32> to vector<16x256xf32>
    %45 = arith.mulf %44, %39 : vector<16x256xf32>
    %46 = vector.extract_strided_slice %2 {offsets = [0, 4], sizes = [16, 1], strides = [1, 1]} : vector<16x9xf32> to vector<16x1xf32>
    %47 = vector.broadcast %46 : vector<16x1xf32> to vector<16x256xf32>
    %48 = arith.mulf %47, %15 : vector<16x256xf32>
    %49 = arith.addf %45, %48 : vector<16x256xf32>
    %50 = vector.extract_strided_slice %2 {offsets = [0, 5], sizes = [16, 1], strides = [1, 1]} : vector<16x9xf32> to vector<16x1xf32>
    %51 = vector.broadcast %50 : vector<16x1xf32> to vector<16x256xf32>
    %52 = arith.mulf %51, %42 : vector<16x256xf32>
    %53 = arith.addf %49, %52 : vector<16x256xf32>
    %54 = vector.extract_strided_slice %2 {offsets = [0, 0], sizes = [16, 1], strides = [1, 1]} : vector<16x9xf32> to vector<16x1xf32>
    %55 = vector.broadcast %54 : vector<16x1xf32> to vector<16x256xf32>
    %56 = arith.mulf %55, %39 : vector<16x256xf32>
    %57 = vector.extract_strided_slice %2 {offsets = [0, 1], sizes = [16, 1], strides = [1, 1]} : vector<16x9xf32> to vector<16x1xf32>
    %58 = vector.broadcast %57 : vector<16x1xf32> to vector<16x256xf32>
    %59 = arith.mulf %58, %15 : vector<16x256xf32>
    %60 = arith.addf %56, %59 : vector<16x256xf32>
    %61 = vector.extract_strided_slice %2 {offsets = [0, 2], sizes = [16, 1], strides = [1, 1]} : vector<16x9xf32> to vector<16x1xf32>
    %62 = vector.broadcast %61 : vector<16x1xf32> to vector<16x256xf32>
    %63 = arith.mulf %62, %42 : vector<16x256xf32>
    %64 = arith.addf %60, %63 : vector<16x256xf32>
    %c16_i32 = arith.constant 16 : i32
    %65 = tpu.dynamic_rotate %64 by %c16_i32 dim 1 : vector<16x256xf32>, i32 -> vector<16x256xf32>
    %66 = vector.broadcast %32 : vector<1x256xf32> to vector<16x256xf32>
    %67 = arith.mulf %65, %66 : vector<16x256xf32>
    %68 = arith.addf %53, %67 : vector<16x256xf32>
    %69 = vector.extract_strided_slice %2 {offsets = [0, 6], sizes = [16, 1], strides = [1, 1]} : vector<16x9xf32> to vector<16x1xf32>
    %70 = vector.broadcast %69 : vector<16x1xf32> to vector<16x256xf32>
    %71 = arith.mulf %70, %39 : vector<16x256xf32>
    %72 = vector.extract_strided_slice %2 {offsets = [0, 7], sizes = [16, 1], strides = [1, 1]} : vector<16x9xf32> to vector<16x1xf32>
    %73 = vector.broadcast %72 : vector<16x1xf32> to vector<16x256xf32>
    %74 = arith.mulf %73, %15 : vector<16x256xf32>
    %75 = arith.addf %71, %74 : vector<16x256xf32>
    %76 = vector.extract_strided_slice %2 {offsets = [0, 8], sizes = [16, 1], strides = [1, 1]} : vector<16x9xf32> to vector<16x1xf32>
    %77 = vector.broadcast %76 : vector<16x1xf32> to vector<16x256xf32>
    %78 = arith.mulf %77, %42 : vector<16x256xf32>
    %79 = arith.addf %75, %78 : vector<16x256xf32>
    %c240_i32 = arith.constant 240 : i32
    %80 = tpu.dynamic_rotate %79 by %c240_i32 dim 1 : vector<16x256xf32>, i32 -> vector<16x256xf32>
    %81 = vector.broadcast %36 : vector<1x256xf32> to vector<16x256xf32>
    %82 = arith.mulf %80, %81 : vector<16x256xf32>
    %83 = arith.addf %68, %82 : vector<16x256xf32>
    %84 = vector.broadcast %4 : vector<16x1xf32> to vector<16x256xf32>
    %85 = arith.addf %83, %84 : vector<16x256xf32>
    %cst_9 = arith.constant 5.000000e-01 : f32
    %86 = vector.broadcast %cst_9 : f32 to vector<16x256xf32>
    %87 = arith.mulf %86, %85 : vector<16x256xf32>
    %88 = arith.mulf %85, %85 : vector<16x256xf32>
    %89 = arith.mulf %88, %85 : vector<16x256xf32>
    %cst_10 = arith.constant 4.471500e-02 : f32
    %90 = vector.broadcast %cst_10 : f32 to vector<16x256xf32>
    %91 = arith.mulf %90, %89 : vector<16x256xf32>
    %92 = arith.addf %85, %91 : vector<16x256xf32>
    %cst_11 = arith.constant 0.797884583 : f32
    %93 = vector.broadcast %cst_11 : f32 to vector<16x256xf32>
    %94 = arith.mulf %93, %92 : vector<16x256xf32>
    %95 = math.tanh %94 : vector<16x256xf32>
    %cst_12 = arith.constant 1.000000e+00 : f32
    %96 = vector.broadcast %cst_12 : f32 to vector<16x256xf32>
    %97 = arith.addf %96, %95 : vector<16x256xf32>
    %98 = arith.mulf %87, %97 : vector<16x256xf32>
    %cst_13 = arith.constant dense<0.000000e+00> : vector<1x256xf32>
    %99 = tpu.matmul %9, %98, %cst_13 {dimension_numbers = #tpu.dot_dimension_numbers<[1], [0], [0], [1], [0, 0, 1, 1], [], []>} : vector<1x16xf32>, vector<16x256xf32>, vector<1x256xf32> -> vector<1x256xf32>
    %100 = vector.broadcast %10 : vector<1x1xf32> to vector<1x256xf32>
    %101 = arith.addf %99, %100 : vector<1x256xf32>
    %cst_14 = arith.constant 5.000000e-01 : f32
    %102 = vector.broadcast %cst_14 : f32 to vector<1x256xf32>
    %103 = arith.mulf %102, %101 : vector<1x256xf32>
    %104 = arith.mulf %101, %101 : vector<1x256xf32>
    %105 = arith.mulf %104, %101 : vector<1x256xf32>
    %cst_15 = arith.constant 4.471500e-02 : f32
    %106 = vector.broadcast %cst_15 : f32 to vector<1x256xf32>
    %107 = arith.mulf %106, %105 : vector<1x256xf32>
    %108 = arith.addf %101, %107 : vector<1x256xf32>
    %cst_16 = arith.constant 0.797884583 : f32
    %109 = vector.broadcast %cst_16 : f32 to vector<1x256xf32>
    %110 = arith.mulf %109, %108 : vector<1x256xf32>
    %111 = math.tanh %110 : vector<1x256xf32>
    %cst_17 = arith.constant 1.000000e+00 : f32
    %112 = vector.broadcast %cst_17 : f32 to vector<1x256xf32>
    %113 = arith.addf %112, %111 : vector<1x256xf32>
    %114 = arith.mulf %103, %113 : vector<1x256xf32>
    %115 = vector.broadcast %114 : vector<1x256xf32> to vector<16x256xf32>
    %116 = arith.subf %98, %115 : vector<16x256xf32>
    %117 = vector.broadcast %5 : vector<16x1xf32> to vector<16x256xf32>
    %118 = arith.mulf %117, %116 : vector<16x256xf32>
    %119 = arith.addf %98, %118 : vector<16x256xf32>
    %cst_18 = arith.constant dense<0.000000e+00> : vector<8x256xf32>
    %120 = tpu.matmul %7, %119, %cst_18 {dimension_numbers = #tpu.dot_dimension_numbers<[1], [0], [0], [1], [0, 0, 1, 1], [], []>} : vector<8x16xf32>, vector<16x256xf32>, vector<8x256xf32> -> vector<8x256xf32>
    %121 = vector.broadcast %8 : vector<8x1xf32> to vector<8x256xf32>
    %122 = arith.addf %120, %121 : vector<8x256xf32>
    %c0_19 = arith.constant 0 : index
    %c0_20 = arith.constant 0 : index
    %c0_21 = arith.constant 0 : index
    %123 = vector.load %arg4[%c0_19, %c0_20, %c0_21] : memref<1x8x256xf32, #tpu.memory_space<vmem>>, vector<1x8x256xf32>
    %124 = vector.shape_cast %123 : vector<1x8x256xf32> to vector<8x256xf32>
    %125 = vector.shape_cast %122 : vector<8x256xf32> to vector<1x8x256xf32>
    tpu.vector_store %arg4[%c0_19, %c0_20, %c0_21], %125 {strides = array<i32>} : memref<1x8x256xf32, #tpu.memory_space<vmem>>, vector<1x8x256xf32>,
    return
  }
  func.func @transform_0(%arg0: i32) -> (i32, i32, i32) {
    %c0_i32 = arith.constant 0 : i32
    %c0_i32_0 = arith.constant 0 : i32
    %c0_i32_1 = arith.constant 0 : i32
    return %arg0, %c0_i32, %c0_i32_0 : i32, i32, i32
  }
  func.func @transform_1(%arg0: i32) -> (i32, i32) {
    %c0_i32 = arith.constant 0 : i32
    %c0_i32_0 = arith.constant 0 : i32
    %c0_i32_1 = arith.constant 0 : i32
    return %c0_i32, %c0_i32_0 : i32, i32
  }
  func.func @transform_2(%arg0: i32) -> (i32, i32) {
    %c0_i32 = arith.constant 0 : i32
    %c0_i32_0 = arith.constant 0 : i32
    %c0_i32_1 = arith.constant 0 : i32
    return %c0_i32, %c0_i32_0 : i32, i32
  }
  func.func @transform_3(%arg0: i32) -> (i32, i32, i32) {
    %c0_i32 = arith.constant 0 : i32
    %c0_i32_0 = arith.constant 0 : i32
    %c0_i32_1 = arith.constant 0 : i32
    return %arg0, %c0_i32, %c0_i32_0 : i32, i32, i32
  }
}

</mosaic_0001>

<bundles_post_ra>
// kernel: channel_aggregation_ffn.1
= control target key start
LH: loop header
LB: loop body
LE: loop exit
PB: predicated region body
PF: predicated region fallthrough
CT: control target
= control target key end

     0   :  { %s965_s12 = smov 0   ;;  %s1179_s0 = inlined_call_operand.vmem [shape: f32[2,4,256], index: 0, kind: input, shape index: {}]   ;;  %s1180_s1 = inlined_call_operand.vmem [shape: f32[16,16], index: 1, kind: input, shape index: {}]   ;;  %s1181_s2 = inlined_call_operand.vmem [shape: f32[9,18], index: 2, kind: input, shape index: {}]   ;;  %s1182_s3 = inlined_call_operand.vmem [shape: f32[2,8,256], index: 3, kind: output, shape index: {}]  }
   0x1 LB: > { %s822_s13 = sadd.s32 4294967295, %s924_s12   ;;  %p826_p0 = scmp.ge.s32.totalorder %s924_s12, 1  ;;  %s924_s12 = sphi %s965_s12, %s13_s12  }
   0x2   : > { %p137_p1 = scmp.lt.s32.totalorder %s924_s12, 3 }
   0x4   : > { %p138_p2 = pnand %p826_p0, %p137_p1 }
   0x5   : > { %p161_p3 = scmp.lt.s32.totalorder (!%p138_p2), %s822_s13, 1  ;;  %v926_v0 = vmov (!%p138_p2), 0.0   ;;  %v980_v1 = vld [vmem:[%s1180_s1] sm:$0xff] (!%p138_p2)  ;;  %v927_v2 = vmov (!%p138_p2), 4   ;;  %v928_v3 = vmov (!%p138_p2), 13   ;;  %vm193_vm0 = vcmask (!%p138_p2), 1043456  }
   0x6   : > { %141 = sbr.rel (%p138_p2) target bundleno = 1008 (0x3f0), region = 32  ;;  %262 = vmatprep.mubr.f32.mxu0 (!%p138_p2), %v926_v0  ;;  %634 = vmatprep.mubr.f32.mxu1 (!%p138_p2), %v926_v0  ;;  %v991_v5 = vld [vmem:[%s1180_s1 + $0x8] sm:$0xff] (!%p138_p2)  ;;  %vm188_vm1 = vcmask (!%p138_p2), 31744   ;;  %v929_v7 = vmov (!%p138_p2), 5   ;;  %v930_v8 = vmov (!%p138_p2), 10   ;;  %v931_v9 = vmov (!%p138_p2), 11  }
   0x7   : > { %883 = vset.pattern.permute.xlu1 (!%p138_p2), %v927_v2  ;;  %882 = vset.pattern.permute.xlu0 (!%p138_p2), %v928_v3  ;;  %v932_v10 = vmov (!%p138_p2), 6   ;;  %v933_v11 = vmov (!%p138_p2), 12   ;;  %v934_v12 = vmov (!%p138_p2), 7   ;;  %s935_s22 = smov (!%p138_p2), 127   ;;  %s936_s23 = smov (!%p138_p2), 1   ;;  %v937_v23 = vmov (!%p138_p2), 8  }
   0x8   : > { %385 = vperm.xlu1 (!%p138_p2), %883, %v980_v1   ;;  %178 = vperm.xlu0 (!%p138_p2), %882, %v980_v1   ;;  %v938_v24 = vmov (!%p138_p2), 14   ;;  %v939_v25 = vmov (!%p138_p2), 9   ;;  %v275_v34 = vlaneseq (!%p138_p2)  ;;  %s940_s24 = smov (!%p138_p2), 16   ;;  %s941_s25 = smov (!%p138_p2), 112   ;;  %vm567_vm12 = vcmask (!%p138_p2), 130048  }
   0xa   : > { %v1047_v37 = vand.u32 (!%p138_p2), 127, %v275_v34 }
   0xc   : > { %389 = vperm.xlu1 (!%p138_p2), %883, %v991_v5   ;;  %183 = vperm.xlu0 (!%p138_p2), %882, %v991_v5   ;;  %v1054_v40 = vadd.s32 (!%p138_p2), 128, %v1047_v37  ;;  %v278_v41 = vand.u32 (!%p138_p2), 15, %v1047_v37  ;;  %vm314_vm4 = vcmp.lt.s32.totalorder (!%p138_p2), %v1047_v37, 1  ;;  %vm331_vm7 = vcmp.lt.s32.totalorder (!%p138_p2), %v1047_v37, 127 }
   0xd   : > { %s1184_s13 = smov (!%p161_p3, %s822_s13), 1  ;;  %vm436_vm9 = vcmp.lt.s32.totalorder %v1047_v37, 16  ;;  %vm501_vm11 = vcmp.lt.s32.totalorder %v1047_v37, 112 }
   0xe   : > { %s845_s16 = sshll.u32 %s1184_s13, 3  ;;  %v279_v42 = vand.u32 15, %v1054_v40  ;;  %vm282_vm2 = vcmp.ge.s32.totalorder %v278_v41, 1  ;;  %vm288_vm5 = vcmp.le.s32.totalorder %v278_v41, 14  ;;  %s846_s30 = sshll.u32 %s1184_s13, 4 }
   0xf   : > { %s165_s19 = scalar_lea.vmem %s1179_s0, %s845_s16  ;;  %v835_v45 = vsel %vm282_vm2, 1.0, %v926_v0  ;;  %v837_v52 = vsel %vm288_vm5, 1.0, %v926_v0  ;;  %s170_s6 = scalar_lea.vmem %s1182_s3, %s846_s30 }
  0x10   : > { %v175_v4 = vld [vmem:[%s165_s19] sm:$0xff]  ;;  %885 = vset.pattern.permute.xlu1 %v929_v7  ;;  %884 = vset.pattern.permute.xlu0 %v929_v7  ;;  %vm283_vm3 = vcmp.ge.s32.totalorder %v279_v42, 1  ;;  %vm289_vm6 = vcmp.le.s32.totalorder %v279_v42, 14 }
  0x11   : > { %v187_v6 = vcombine.high %v175_v4, %v175_v4  ;;  %401 = vperm.xlu1 %885, %v991_v5   ;;  %397 = vperm.xlu0 %884, %v980_v1   ;;  %v836_v48 = vsel %vm283_vm3, 1.0, %v926_v0  ;;  %v838_v53 = vsel %vm289_vm6, 1.0, %v926_v0 }
  0x13   : > { %831 = vmatprep.subr.msk.mxu0 %vm193_vm0, %v187_v6 }
  0x14   : > { %832 = vmatpush1.msk.msra.mxu0 %vm193_vm0, %v175_v4 }
  0x15   : > { %833 = vmatmul.mubr.msk.f32.vlgmr.msra.gmra.mrb[0].mxu0 %vm188_vm1, %v980_v1  ;;  %886 = vset.pattern.permute.xlu1 %v930_v8 }
  0x16   : > { %268 = vmatprep.mubr.f32.mxu0 %v926_v0  ;;  %450 = vperm.xlu1 %886, %v980_v1  }
  0x17   : > { %887 = vset.pattern.permute.xlu0 %v930_v8 }
  0x18   : > { %454 = vperm.xlu0 %887, %v991_v5  }
  0x19   : > { %834 = vmatmul.mubr.msk.f32.gmra.mrb[2].mxu0 %vm188_vm1, %v991_v5 }
  0x1a   : > { %888 = vset.pattern.permute.xlu1 %v931_v9 }
  0x1b   : > { %462 = vperm.xlu1 %888, %v980_v1  }
  0x1c   : > { %889 = vset.pattern.permute.xlu0 %v932_v10 }
  0x1d   : > { %413 = vperm.xlu0 %889, %v980_v1  }
  0x1f   : > { %466 = vperm.xlu1 %888, %v991_v5  }
  0x21   : > { %892 = vset.pattern.permute.xlu0 %v933_v11 }
  0x22   : > { %482 = vperm.xlu0 %892, %v991_v5  }
  0x23   : > { %890 = vset.pattern.permute.xlu1 %v932_v10 }
  0x24   : > { %417 = vperm.xlu1 %890, %v991_v5  }
  0x26   : > { %893 = vset.pattern.permute.xlu0 %v934_v12 }
  0x28   : > { %891 = vset.pattern.permute.xlu1 %v933_v11 }
  0x29   : > { %478 = vperm.xlu1 %891, %v980_v1  }
  0x2d   : > { %894 = vset.pattern.permute.xlu1 %v934_v12 }
  0x87   : > { %v179_v13 = vpop.permute.xlu0 %178  ;;  %v386_v26 = vpop.permute.xlu1 %385 }
  0x8b   : > { %v184_v17 = vpop.permute.xlu0 %183  ;;  %v1032_v27 = vpop.permute.xlu1 %389 }
  0x90   : > { %v1034_v28 = vpop.permute.xlu1 %401  ;;  %v398_v31 = vpop.permute.xlu0 %397 }
  0x95   : > { %v1036_v29 = vpop.permute.xlu1 %450 }
  0x97   : > { %v1040_v32 = vpop.permute.xlu0 %454 }
  0x9a   : > { %v1038_v30 = vpop.permute.xlu1 %462 }
  0x9c   : > { %v414_v36 = vpop.permute.xlu0 %413 }
  0x9e   : > { %v1042_v33 = vpop.permute.xlu1 %466 }
  0xa1   : > { %v1051_v39 = vpop.permute.xlu0 %482 }
  0xa3   : > { %v1044_v35 = vpop.permute.xlu1 %417 }
  0xa8   : > { %v1049_v38 = vpop.permute.xlu1 %478 }
  0xe8   : > { %v264_v14 = vpop.f32.mrb[0].mxu0 }
  0xe9   : > { %v1008_v15 = vadd.f32 %v264_v14, %v179_v13  ;;  %v266_v16 = vpop.f32.mrb[1].mxu0 }
  0xea   : > { %v1012_v19 = vadd.f32 %v266_v16, %v179_v13 }
  0xeb   : > { %323 = vrot.lane.b32.xlu0 %v1008_v15, %s935_s22  ;;  %306 = vrot.lane.b32.xlu1 %v1008_v15, %s936_s23  ;;  %v404_v60 = vmul.f32 %v398_v31, %v1008_v15 }
  0xec   : > { %v270_v18 = vpop.f32.mrb[2].mxu0  ;;  %v405_v8 = vmul.f32 %v398_v31, %v1012_v19 }
  0xed   : > { %v1014_v20 = vadd.f32 %v270_v18, %v184_v17  ;;  %v272_v21 = vpop.f32.mrb[3].mxu0  ;;  %v469_v18 = vmul.f32 %v1038_v30, %v1008_v15 }
  0xee   : > { %v1020_v22 = vadd.f32 %v272_v21, %v184_v17 }
  0xef   : > { %310 = vrot.lane.b32.xlu0 %v1012_v19, %s936_s23  ;;  %308 = vrot.lane.b32.xlu1 %v1014_v20, %s936_s23 }
  0xf3   : > { %327 = vrot.lane.b32.xlu0 %v1012_v19, %s935_s22  ;;  %325 = vrot.lane.b32.xlu1 %v1014_v20, %s935_s22 }
  0xf7   : > { %341 = vperm.xlu0 %893, %v980_v1   ;;  %312 = vrot.lane.b32.xlu1 %v1020_v22, %s936_s23 }
  0xfb   : > { %896 = vset.pattern.permute.xlu0 %v937_v23  ;;  %329 = vrot.lane.b32.xlu1 %v1020_v22, %s935_s22 }
  0xfc   : > { %357 = vperm.xlu0 %896, %v991_v5  }
  0xff   : > { %345 = vperm.xlu1 %894, %v991_v5  }
 0x100   : > { %898 = vset.pattern.permute.xlu0 %v938_v24 }
 0x101   : > { %515 = vperm.xlu0 %898, %v980_v1  }
 0x103   : > { %895 = vset.pattern.permute.xlu1 %v937_v23 }
 0x104   : > { %353 = vperm.xlu1 %895, %v980_v1  }
 0x108   : > { %897 = vset.pattern.permute.xlu1 %v939_v25 }
 0x109   : > { %369 = vperm.xlu1 %897, %v980_v1  }
 0x10d   : > { %373 = vperm.xlu1 %897, %v991_v5  }
 0x111   : > { %899 = vset.pattern.permute.xlu1 %v938_v24  ;;  %v406_v24 = vmul.f32 %v1034_v28, %v1014_v20 }
 0x112   : > { %519 = vperm.xlu1 %899, %v991_v5  }
 0x15d   : > { %v324_v43 = vpop.permute.xlu0 %323  ;;  %v307_v44 = vpop.permute.xlu1 %306 }
 0x161   : > { %v311_v46 = vpop.permute.xlu0 %310  ;;  %v309_v47 = vpop.permute.xlu1 %308 }
 0x162   : > { %v315_v49 = vsel %vm314_vm4, %v307_v44, %v311_v46  ;;  %v317_v50 = vsel %vm314_vm4, %v311_v46, %v307_v44  ;;  %v470_v46 = vmul.f32 %v1038_v30, %v1012_v19  ;;  %v471_v30 = vmul.f32 %v1042_v33, %v1014_v20 }
 0x163   : > { %v1065_v51 = vmul.f32 %v835_v45, %v317_v50  ;;  %v1070_v54 = vmul.f32 %v836_v48, %v315_v49 }
 0x165   : > { %v392_v55 = vmul.f32 %v386_v26, %v1065_v51  ;;  %v328_v56 = vpop.permute.xlu0 %327  ;;  %v326_v57 = vpop.permute.xlu1 %325  ;;  %v393_v63 = vmul.f32 %v386_v26, %v1070_v54  ;;  %v457_v12 = vmul.f32 %v1036_v29, %v1065_v51  ;;  %v458_v41 = vmul.f32 %v1036_v29, %v1070_v54 }
 0x166   : > { %v332_v58 = vsel %vm331_vm7, %v324_v43, %v328_v56  ;;  %v334_v59 = vsel %vm331_vm7, %v328_v56, %v324_v43 }
 0x167   : > { %v1078_v61 = vmul.f32 %v837_v52, %v332_v58  ;;  %v1080_v62 = vmul.f32 %v838_v53, %v334_v59  ;;  %v408_v3 = vadd.f32 %v404_v60, %v392_v55  ;;  %v409_v17 = vadd.f32 %v405_v8, %v393_v63 }
 0x169   : > { %v313_v2 = vpop.permute.xlu1 %312  ;;  %v420_v4 = vmul.f32 %v414_v36, %v1078_v61  ;;  %v421_v11 = vmul.f32 %v414_v36, %v1080_v62  ;;  %v485_v36 = vmul.f32 %v1049_v38, %v1078_v61  ;;  %v486_v29 = vmul.f32 %v1049_v38, %v1080_v62 }
 0x16a   : > { %v316_v6 = vsel %vm314_vm4, %v309_v47, %v313_v2  ;;  %v318_v7 = vsel %vm314_vm4, %v313_v2, %v309_v47  ;;  %v407_v47 = vmul.f32 %v1034_v28, %v1020_v22 }
 0x16b   : > { %v321_v9 = vmul.f32 %v835_v45, %v318_v7  ;;  %v424_v10 = vadd.f32 %v420_v4, %v408_v3  ;;  %v322_v13 = vmul.f32 %v836_v48, %v316_v6  ;;  %v425_v31 = vadd.f32 %v421_v11, %v409_v17 }
 0x16c   : > { %v473_v45 = vadd.f32 %v469_v18, %v457_v12 }
 0x16d   : > { %v394_v14 = vmul.f32 %v1032_v27, %v321_v9  ;;  %v330_v16 = vpop.permute.xlu1 %329  ;;  %428 = vrot.lane.b32.xlu1 %v424_v10, %s940_s24  ;;  %v395_v42 = vmul.f32 %v1032_v27, %v322_v13  ;;  %v459_v27 = vmul.f32 %v1040_v32, %v321_v9 }
 0x16e   : > { %v333_v21 = vsel %vm331_vm7, %v326_v57, %v330_v16  ;;  %v335_v23 = vsel %vm331_vm7, %v330_v16, %v326_v57  ;;  %v489_v49 = vadd.f32 %v485_v36, %v473_v45  ;;  %v472_v57 = vmul.f32 %v1042_v33, %v1020_v22  ;;  %v1137_v36 = vld [vmem:[%s1181_s2 + $0x8] sm:$0x1] }
 0x16f   : > { %v338_v25 = vmul.f32 %v837_v52, %v333_v21  ;;  %v339_v26 = vmul.f32 %v838_v53, %v335_v23  ;;  %v410_v43 = vadd.f32 %v406_v24, %v394_v14  ;;  %v411_v52 = vadd.f32 %v407_v47, %v395_v42 }
 0x170   : > { %v474_v53 = vadd.f32 %v470_v46, %v458_v41  ;;  %v475_v38 = vadd.f32 %v471_v30, %v459_v27  ;;  %v281_v42 = vshrl.u32 %v1054_v40, 4 }
 0x171   : > { %432 = vrot.lane.b32.xlu1 %v425_v31, %s940_s24  ;;  %v422_v44 = vmul.f32 %v1044_v35, %v338_v25  ;;  %v423_v50 = vmul.f32 %v1044_v35, %v339_v26  ;;  %v487_v56 = vmul.f32 %v1051_v39, %v338_v25  ;;  %v460_v35 = vmul.f32 %v1040_v32, %v322_v13 }
 0x172   : > { %v490_v28 = vadd.f32 %v486_v29, %v474_v53  ;;  %v488_v59 = vmul.f32 %v1051_v39, %v339_v26  ;;  %vm301_vm10 = vcmp.le.s32.totalorder %v281_v42, 14 }
 0x173   : > { %v426_v48 = vadd.f32 %v422_v44, %v410_v43  ;;  %v427_v55 = vadd.f32 %v423_v50, %v411_v52  ;;  %v491_v58 = vadd.f32 %v487_v56, %v475_v38  ;;  %v476_v60 = vadd.f32 %v472_v57, %v460_v35 }
 0x174   : > { %v840_v47 = vsel %vm301_vm10, 1.0, %v926_v0 }
 0x175   : > { %430 = vrot.lane.b32.xlu0 %v426_v48, %s940_s24  ;;  %493 = vrot.lane.b32.xlu1 %v489_v49, %s941_s25  ;;  %v492_v2 = vadd.f32 %v488_v59, %v476_v60 }
 0x176   : > { %v342_v3 = vpop.permute.xlu0 %341 }
 0x177   : > { %v348_v7 = vmul.f32 %v342_v3, %v1065_v51  ;;  %v349_v8 = vmul.f32 %v342_v3, %v1070_v54 }
 0x179   : > { %434 = vrot.lane.b32.xlu0 %v427_v55, %s940_s24  ;;  %497 = vrot.lane.b32.xlu1 %v490_v28, %s941_s25 }
 0x17b   : > { %v358_v10 = vpop.permute.xlu0 %357 }
 0x17c   : > { %v362_v18 = vmul.f32 %v358_v10, %v1014_v20 }
 0x17d   : > { %495 = vrot.lane.b32.xlu0 %v491_v58, %s941_s25 }
 0x17e   : > { %v346_v63 = vpop.permute.xlu1 %345 }
 0x17f   : > { %v350_v33 = vmul.f32 %v346_v63, %v321_v9  ;;  %v351_v11 = vmul.f32 %v346_v63, %v322_v13 }
 0x181   : > { %499 = vrot.lane.b32.xlu0 %v492_v2, %s941_s25  ;;  %v366_v51 = vadd.f32 %v362_v18, %v350_v33 }
 0x183   : > { %v354_v4 = vpop.permute.xlu1 %353 }
 0x184   : > { %v360_v6 = vmul.f32 %v354_v4, %v1008_v15  ;;  %v361_v32 = vmul.f32 %v354_v4, %v1012_v19  ;;  %v363_v15 = vmul.f32 %v358_v10, %v1020_v22  ;;  %v280_v22 = vshrl.u32 %v1047_v37, 4 }
 0x186   : > { %v364_v39 = vadd.f32 %v360_v6, %v348_v7  ;;  %v365_v14 = vadd.f32 %v361_v32, %v349_v8  ;;  %v367_v24 = vadd.f32 %v363_v15, %v351_v11  ;;  %vm294_vm8 = vcmp.ge.s32.totalorder %v280_v22, 1 }
 0x187   : > { %v839_v43 = vsel %vm294_vm8, 1.0, %v926_v0 }
 0x188   : > { %v370_v12 = vpop.permute.xlu1 %369 }
 0x189   : > { %v376_v16 = vmul.f32 %v370_v12, %v1078_v61  ;;  %v377_v17 = vmul.f32 %v370_v12, %v1080_v62  ;;  %v942_v61 = vmov 17   ;;  %v943_v62 = vmov 15  }
 0x18a   : > { %900 = vset.pattern.permute.xlu1 %v942_v61  ;;  %901 = vset.pattern.permute.xlu0 %v943_v62 }
 0x18b   : > { %v380_v21 = vadd.f32 %v376_v16, %v364_v39  ;;  %v381_v19 = vadd.f32 %v377_v17, %v365_v14  ;;  %564 = vperm.xlu1 %900, %v1137_v36   ;;  %672 = vperm.xlu0 %901, %v980_v1  }
 0x18c   : > { %v374_v23 = vpop.permute.xlu1 %373 }
 0x18d   : > { %v378_v54 = vmul.f32 %v374_v23, %v338_v25  ;;  %v379_v31 = vmul.f32 %v374_v23, %v339_v26  ;;  %v516_v26 = vpop.permute.xlu0 %515 }
 0x18f   : > { %v382_v9 = vadd.f32 %v378_v54, %v366_v51  ;;  %v383_v13 = vadd.f32 %v379_v31, %v367_v24  ;;  %902 = vset.pattern.permute.xlu1 %v943_v62 }
 0x190   : > { %676 = vperm.xlu1 %902, %v991_v5  }
 0x191   : > { %v520_v20 = vpop.permute.xlu1 %519 }
 0x1df   : > { %v429_v25 = vpop.permute.xlu1 %428 }
 0x1e3   : > { %v433_v41 = vpop.permute.xlu1 %432 }
 0x1e4   : > { %v439_v44 = vsel %vm436_vm9, %v433_v41, %v429_v25  ;;  %v437_v5 = vsel %vm436_vm9, %v429_v25, %v433_v41 }
 0x1e5   : > { %v441_v1 = vmul.f32 %v839_v43, %v439_v44  ;;  %v446_v52 = vadd.f32 %v437_v5, %v381_v19 }
 0x1e7   : > { %v431_v45 = vpop.permute.xlu0 %430  ;;  %v494_v46 = vpop.permute.xlu1 %493  ;;  %v445_v49 = vadd.f32 %v441_v1, %v380_v21 }
 0x1eb   : > { %v435_v48 = vpop.permute.xlu0 %434  ;;  %v498_v50 = vpop.permute.xlu1 %497 }
 0x1ec   : > { %v440_v40 = vsel %vm436_vm9, %v435_v48, %v431_v45  ;;  %v502_v29 = vsel %vm501_vm11, %v494_v46, %v498_v50  ;;  %v504_v27 = vsel %vm501_vm11, %v498_v50, %v494_v46  ;;  %v438_v58 = vsel %vm436_vm9, %v431_v45, %v435_v48  ;;  %v173_v50 = vld [vmem:[%s1181_s2] sm:$0xff] }
 0x1ed   : > { %v507_v53 = vmul.f32 %v840_v47, %v504_v27  ;;  %v510_v30 = vadd.f32 %v502_v29, %v445_v49  ;;  %v443_v55 = vmul.f32 %v839_v43, %v440_v40  ;;  %v448_v6 = vadd.f32 %v438_v58, %v383_v13 }
 0x1ee   : > { %v944_v40 = vmov 16  }
 0x1ef   : > { %v511_v28 = vadd.f32 %v507_v53, %v446_v52  ;;  %v522_v56 = vadd.f32 %v516_v26, %v510_v30  ;;  %v496_v35 = vpop.permute.xlu0 %495  ;;  %v447_v63 = vadd.f32 %v443_v55, %v382_v9  ;;  %903 = vset.pattern.permute.xlu1 %v944_v40  ;;  %904 = vset.pattern.permute.xlu0 %v944_v40 }
 0x1f0   : > { %689 = vperm.xlu1 %903, %v173_v50  }
 0x1f1   : > { %v523_v38 = vadd.f32 %v516_v26, %v511_v28  ;;  %v530_v57 = vmul.f32 %v522_v56, %v522_v56  ;;  %v526_v1 = vmul.f32 0.5, %v522_v56 }
 0x1f3   : > { %v534_v59 = vmul.f32 %v530_v57, %v522_v56  ;;  %v500_v60 = vpop.permute.xlu0 %499  ;;  %v531_v2 = vmul.f32 %v523_v38, %v523_v38  ;;  %v527_v42 = vmul.f32 0.5, %v523_v38 }
 0x1f4   : > { %v503_v3 = vsel %vm501_vm11, %v496_v35, %v500_v60  ;;  %v505_v4 = vsel %vm501_vm11, %v500_v60, %v496_v35  ;;  %v660_v60 = vshrl.u32 %v275_v34, 7 }
 0x1f5   : > { %v509_v32 = vmul.f32 %v840_v47, %v505_v4  ;;  %v512_v7 = vadd.f32 %v503_v3, %v447_v63  ;;  %v535_v8 = vmul.f32 %v531_v2, %v523_v38  ;;  %v538_v10 = vmul.f32 0.044715, %v534_v59 }
 0x1f6   : > { %v661_v3 = vsub.s32 0, %v660_v60 }
 0x1f7   : > { %v513_v33 = vadd.f32 %v509_v32, %v448_v6  ;;  %v524_v11 = vadd.f32 %v520_v20, %v512_v7  ;;  %v539_v12 = vmul.f32 0.044715, %v535_v8  ;;  %v542_v17 = vadd.f32 %v538_v10, %v522_v56 }
 0x1f9   : > { %v525_v39 = vadd.f32 %v520_v20, %v513_v33  ;;  %v532_v14 = vmul.f32 %v524_v11, %v524_v11  ;;  %v543_v16 = vadd.f32 %v539_v12, %v523_v38  ;;  %v546_v51 = vmul.f32 0.7978846, %v542_v17 }
 0x1fa   : > { %v528_v26 = vmul.f32 0.5, %v524_v11 }
 0x1fb   : > { %v536_v18 = vmul.f32 %v532_v14, %v524_v11  ;;  %v533_v15 = vmul.f32 %v525_v39, %v525_v39  ;;  %v547_v23 = vmul.f32 0.7978846, %v543_v16  ;;  %v529_v43 = vmul.f32 0.5, %v525_v39 }
 0x1fd   : > { %v540_v21 = vmul.f32 0.044715, %v536_v18  ;;  %v537_v19 = vmul.f32 %v533_v15, %v525_v39  ;;  %906 = vtanh.f32 %v547_v23 }
 0x1fe   : > { %908 = vtanh.f32 %v546_v51 }
 0x1ff   : > { %v541_v37 = vmul.f32 0.044715, %v537_v19  ;;  %v544_v24 = vadd.f32 %v540_v21, %v524_v11 }
 0x201   : > { %v545_v54 = vadd.f32 %v541_v37, %v525_v39  ;;  %v548_v31 = vmul.f32 0.7978846, %v544_v24 }
 0x203   : > { %v549_v9 = vmul.f32 0.7978846, %v545_v54  ;;  %910 = vtanh.f32 %v548_v31 }
 0x205   : > { %912 = vtanh.f32 %v549_v9 }
 0x207   : > { %v907_v13 = vpop.eup %906 }
 0x208   : > { %v909_v61 = vpop.eup %908  ;;  %v555_v20 = vadd.f32 1.0, %v907_v13 }
 0x209   : > { %v554_v41 = vadd.f32 1.0, %v909_v61 }
 0x20a   : > { %v559_v46 = vmul.f32 %v555_v20, %v527_v42  ;;  %v565_v29 = vpop.permute.xlu1 %564  ;;  %v673_v11 = vpop.permute.xlu0 %672 }
 0x20b   : > { %v558_v47 = vmul.f32 %v554_v41, %v526_v1 }
 0x20d   : > { %v911_v62 = vpop.eup %910 }
 0x20e   : > { %v556_v22 = vadd.f32 1.0, %v911_v62 }
 0x20f   : > { %v913_v25 = vpop.eup %912  ;;  %v677_v39 = vpop.permute.xlu1 %676 }
 0x210   : > { %v557_v44 = vadd.f32 1.0, %v913_v25  ;;  %v560_v45 = vmul.f32 %v556_v22, %v528_v26 }
 0x212   : > { %v561_v5 = vmul.f32 %v557_v44, %v529_v43  ;;  %v849_v49 = vpack.c.bf16 %v560_v45, %v558_v47 }
 0x214   : > { %v847_v48 = vpack.c.bf16 %v561_v5, %v559_v46 }
 0x216   : > { %848 = vmatprep.subr.bf16.mxu1 %v847_v48 }
 0x217   : > { %850 = vmatpush1.bf16.msra.mxu1 %v849_v49 }
 0x21a   : > { %841 = vmatmul.mubr.msk.f32.vlgmr.msra.gmra.mrb[0].mxu1 %vm567_vm12, %v1137_v36 }
 0x21b   : > { %758 = vmatprep.mubr.f32.mxu1 %v926_v0 }
 0x26f   : > { %v690_v9 = vpop.permute.xlu1 %689 }
 0x2ed   : > { %v636_v27 = vpop.f32.mrb[0].mxu1 }
 0x2ee   : > { %v637_v52 = vadd.f32 %v636_v27, %v565_v29  ;;  %v638_v53 = vpop.f32.mrb[1].mxu1 }
 0x2ef   : > { %v639_v30 = vadd.f32 %v638_v53, %v565_v29 }
 0x2f0   : > { %v643_v55 = vmul.f32 %v637_v52, %v637_v52  ;;  %v641_v4 = vmul.f32 0.5, %v637_v52 }
 0x2f1   : > { %v644_v28 = vmul.f32 %v639_v30, %v639_v30  ;;  %v642_v32 = vmul.f32 0.5, %v639_v30 }
 0x2f2   : > { %v645_v56 = vmul.f32 %v643_v55, %v637_v52 }
 0x2f3   : > { %v646_v35 = vmul.f32 %v644_v28, %v639_v30 }
 0x2f4   : > { %v647_v36 = vmul.f32 0.044715, %v645_v56 }
 0x2f5   : > { %v648_v38 = vmul.f32 0.044715, %v646_v35 }
 0x2f6   : > { %v649_v0 = vadd.f32 %v647_v36, %v637_v52 }
 0x2f7   : > { %v650_v57 = vadd.f32 %v648_v38, %v639_v30 }
 0x2f8   : > { %v651_v58 = vmul.f32 0.7978846, %v649_v0 }
 0x2f9   : > { %v652_v59 = vmul.f32 0.7978846, %v650_v57 }
 0x2fa   : > { %914 = vtanh.f32 %v651_v58 }
 0x2fb   : > { %916 = vtanh.f32 %v652_v59 }
 0x304   : > { %v915_v63 = vpop.eup %914 }
 0x305   : > { %v917_v2 = vpop.eup %916  ;;  %v655_v6 = vadd.f32 1.0, %v915_v63 }
 0x306   : > { %v656_v7 = vadd.f32 1.0, %v917_v2 }
 0x307   : > { %v657_v8 = vmul.f32 %v655_v6, %v641_v4 }
 0x308   : > { %v658_v10 = vmul.f32 %v656_v7, %v642_v32 }
 0x309   : > { %v662_v33 = vrot.slane %v657_v8, %v661_v3 }
 0x30a   : > { %v666_v12 = vrot.slane %v658_v10, %v661_v3 }
 0x30b   : > { %v667_v14 = vsub.f32 %v558_v47, %v662_v33  ;;  %v669_v16 = vsub.f32 %v560_v45, %v662_v33 }
 0x30c   : > { %v668_v17 = vsub.f32 %v559_v46, %v666_v12  ;;  %v670_v18 = vsub.f32 %v561_v5, %v666_v12 }
 0x30d   : > { %v679_v15 = vmul.f32 %v673_v11, %v667_v14  ;;  %v681_v34 = vmul.f32 %v677_v39, %v669_v16 }
 0x30e   : > { %v680_v21 = vmul.f32 %v673_v11, %v668_v17  ;;  %v682_v19 = vmul.f32 %v677_v39, %v670_v18 }
 0x30f   : > { %v683_v23 = vadd.f32 %v679_v15, %v558_v47  ;;  %v685_v51 = vadd.f32 %v681_v34, %v560_v45 }
 0x310   : > { %v684_v37 = vadd.f32 %v680_v21, %v559_v46  ;;  %v686_v24 = vadd.f32 %v682_v19, %v561_v5 }
 0x311   : > { %v853_v31 = vpack.c.bf16 %v685_v51, %v683_v23 }
 0x312   : > { %v851_v54 = vpack.c.bf16 %v686_v24, %v684_v37 }
 0x314   : > { %852 = vmatprep.subr.bf16.mxu1 %v851_v54 }
 0x315   : > { %854 = vmatpush1.bf16.msra.mxu1 %v853_v31 }
 0x318   : > { %842 = vmatmul.mubr.msk.f32.vlgmr.msra.gmra.mrb[2].mxu1 %vm567_vm12, %v173_v50 }
 0x3eb   : > { %v760_v13 = vpop.f32.mrb[2].mxu1 }
 0x3ec   : > { %v762_v61 = vpop.f32.mrb[3].mxu1  ;;  %v761_v62 = vadd.f32 %v760_v13, %v690_v9 }
 0x3ed   : > { %v763_v20 = vadd.f32 %v762_v61, %v690_v9 }
 0x3ee   : > { %765 = vst [vmem:[%s170_s6] sm:$0xff] %v761_v62 }
 0x3ef   : > { %766 = vst [vmem:[%s170_s6 + $0x8] sm:$0xff] %v763_v20 }
 0x3f0 PF: > { %s13_s12 = sadd.s32 1, %s924_s12  }
 0x3f1   : > { %p10_p4 = scmp.ge.s32.totalorder %s13_s12, 4  }
 0x3f3   :  { %12 = sbr.rel (!%p10_p4) target bundleno = 1 (0x1), region = 62 }

</bundles_post_ra>
